<compile_context>
chip_gen: v7x
topology: tpu7x:2x2x1
jax: 0.10.0
libtpu: 0.0.40
codegen_flags: <defaults>
</compile_context>

<pallas_src>
import math

import jax
import jax.numpy as jnp
from jax.experimental import pallas as pl
from jax.experimental.pallas import tpu as pltpu

LN_EPS = 1e-5


def _patch_merge_kernel(x_ref, we_ref, wo_ref, csum_ref, bias_ref, o_ref):
    """Fused 2x2 gather + LayerNorm(4C) + Linear(4C -> 2C, no bias).

    x_ref:    (tr, 2, Wo, 2C)  tr merged rows; axis 1 = input-row parity;
                               lane dim = [col-even C | col-odd C]
    we_ref:   (2C, 2C)         folded weight rows for the row-even half [x0|x2]
    wo_ref:   (2C, 2C)         folded weight rows for the row-odd  half [x1|x3]
    csum_ref: (1, 2C) f32      column sums of the folded 4C x 2C weight
    bias_ref: (1, 2C) f32      beta @ W^T (LN beta folded into a bias)
    o_ref:    (tr, Wo, 2C)     output tile
    """
    xe = x_ref[:, 0, :, :]                      # even input rows (tr, Wo, 2C)
    xo = x_ref[:, 1, :, :]                      # odd  input rows (tr, Wo, 2C)
    tr, wo_, c2 = xe.shape
    n = tr * wo_
    xe2 = xe.reshape(n, c2)
    xo2 = xo.reshape(n, c2)

    # f32 LayerNorm statistics over the full 4C feature set (two 2C halves).
    # Single pass (var = E[x^2] - mean^2), clamped against cancellation so
    # rsqrt never sees a negative argument (incl. garbage tail-block rows).
    xe_f = xe2.astype(jnp.float32)
    xo_f = xo2.astype(jnp.float32)
    inv_c4 = 1.0 / float(2 * c2)
    s = (jnp.sum(xe_f, axis=-1, keepdims=True)
         + jnp.sum(xo_f, axis=-1, keepdims=True))
    sq = (jnp.sum(xe_f * xe_f, axis=-1, keepdims=True)
          + jnp.sum(xo_f * xo_f, axis=-1, keepdims=True))
    mean = s * inv_c4
    var = jnp.maximum(sq * inv_c4 - mean * mean, 0.0)
    inv = jax.lax.rsqrt(var + LN_EPS)

    # Matmul first (activations stay in their native dtype, f32 accumulation),
    # then normalize:  ((x - mean) * inv) @ W'  ==  inv * (x @ W' - mean*csum).
    z = jnp.dot(xe2, we_ref[...], preferred_element_type=jnp.float32)
    z = z + jnp.dot(xo2, wo_ref[...], preferred_element_type=jnp.float32)

    out = inv * (z - mean * csum_ref[...]) + bias_ref[...]
    o_ref[...] = out.reshape(tr, wo_, c2).astype(o_ref.dtype)


def patch_merging_2d(x, gamma, beta, weight, *,
                     tokens_per_tile=4096, min_grid_steps=8):
    """PatchMerging2D forward.

    Args:
      x:      (B, H, W, C) channels-last input.
      gamma:  (4C,)   LayerNorm weight.
      beta:   (4C,)   LayerNorm bias.
      weight: (2C, 4C) torch nn.Linear weight (out_features, in_features).
      tokens_per_tile: target merged-tokens per grid step (amortizes the
                       ~0.35 us per-step overhead).
      min_grid_steps:  keep the 1-D parallel grid at least this long so both
                       v7x TensorCores get work and can pipeline.

    Returns:
      (B, H//2, W//2, 2C) array, same dtype as x.
    """
    B, H, W, C = x.shape
    Ho, Wo = H // 2, W // 2
    if H % 2 != 0 or W % 2 != 0:
        # torch SHAPE_FIX branch (edge case): truncation makes x non-contiguous,
        # so the reshape below becomes a real copy here (and only here).
        x = x[:, : 2 * Ho, : 2 * Wo, :]
    C2, C4 = 2 * C, 4 * C
    R = B * Ho                                   # number of merged rows

    # Free reshape (no data movement): (B, H, W, C) -> (R, 2, Wo, 2C).
    x_r = x.reshape(R, 2, Wo, C2)

    # ---- one-time (trace-side) parameter prep ------------------------------
    # Half-major feature order matching x_r's natural lane layout:
    #   [row-even|col-even (x0), row-even|col-odd (x2),
    #    row-odd |col-even (x1), row-odd |col-odd (x3)]
    f32 = jnp.float32
    w_t = weight.astype(f32).T                   # (4C, 2C), torch order [x0,x1,x2,x3]
    perm = jnp.concatenate([jnp.arange(0, C), jnp.arange(2 * C, 3 * C),
                            jnp.arange(C, 2 * C), jnp.arange(3 * C, 4 * C)])
    w_p = w_t[perm]                              # rows reordered to half-major
    g_p = gamma.astype(f32)[perm]
    w_fold = g_p[:, None] * w_p                  # LN gamma folded into the weight
    bias = (beta.astype(f32) @ w_t).reshape(1, C2)   # LN beta folded into a bias
    # Matmul runs in the activation dtype (bf16 activations -> native MXU path).
    w_fold_m = w_fold.astype(x.dtype)
    csum = jnp.sum(w_fold_m.astype(f32), axis=0).reshape(1, C2)
    w_e = w_fold_m[:C2]                          # (2C, 2C) rows for [x0 | x2]
    w_o = w_fold_m[C2:]                          # (2C, 2C) rows for [x1 | x3]

    # ---- generation-aware VMEM budget & tile size ---------------------------
    itemsize = jnp.dtype(x.dtype).itemsize
    try:
        vmem_cap = int(pltpu.get_tpu_info().vmem_capacity_bytes)
    except Exception:
        vmem_cap = 64 << 20                      # conservative (v7x per-core VMEM)
    ws_budget = min(int(vmem_cap * 0.40), 28 << 20)   # working set incl. temporaries
    vmem_limit = min(int(vmem_cap * 0.75), 96 << 20)

    # Bytes per merged row of the grid block:
    #   double-buffered input block  2 * (2*Wo*2C) * itemsize
    #   double-buffered output block 2 * (Wo*2C)   * itemsize
    #   f32 intermediates (xe_f, xo_f, z) ~= 3 * Wo*2C * 4
    per_row = (2 * (2 * Wo * C2) + 2 * (Wo * C2)) * itemsize + 3 * (Wo * C2) * 4
    fixed = 2 * C2 * C2 * itemsize + 4 * C2 * 4       # resident weights + csum/bias
    tr_budget = max(1, (ws_budget - fixed) // per_row)
    tr_tokens = max(1, (tokens_per_tile + Wo - 1) // Wo)
    tr_grid = max(1, pl.cdiv(R, min_grid_steps))      # keep >= min_grid_steps steps
    tr = int(min(R, tr_tokens, tr_budget, tr_grid))

    # Prefer tr*Wo a multiple of 256 (fills the 256-wide MXU, unmasked stores).
    step = 256 // math.gcd(256, Wo)
    if tr >= step:
        tr = (tr // step) * step

    grid = (pl.cdiv(R, tr),)

    # TODO(synk): for tiny C (2C < 128) a lane-dense output packing would avoid
    # masked partial stores; realistic VMamba dims (C >= 96) are unaffected.
    # TODO(synk): if profiling shows exposed input DMA at small C, bump the x_r
    # BlockSpec to pipeline_mode=pl.Buffered(3) (needs v7x VMEM headroom).
    out = pl.pallas_call(
        _patch_merge_kernel,
        out_shape=jax.ShapeDtypeStruct((R, Wo, C2), x.dtype),
        grid_spec=pltpu.PrefetchScalarGridSpec(
            num_scalar_prefetch=0,
            grid=grid,
            in_specs=[
                pl.BlockSpec((tr, 2, Wo, C2), lambda i: (i, 0, 0, 0)),  # x rows
                pl.BlockSpec((C2, C2), lambda i: (0, 0)),               # W'_even
                pl.BlockSpec((C2, C2), lambda i: (0, 0)),               # W'_odd
                pl.BlockSpec((1, C2), lambda i: (0, 0)),                # colsum(W')
                pl.BlockSpec((1, C2), lambda i: (0, 0)),                # bias
            ],
            out_specs=pl.BlockSpec((tr, Wo, C2), lambda i: (i, 0, 0)),
        ),
        compiler_params=pltpu.CompilerParams(
            dimension_semantics=("parallel",),
            vmem_limit_bytes=int(vmem_limit)),
    )(x_r, w_e, w_o, csum, bias)

    return out.reshape(B, Ho, Wo, C2)


def _reference(x, gamma, beta, weight):
    """Pure-JAX reference matching the PyTorch forward."""
    x0 = x[:, 0::2, 0::2, :]
    x1 = x[:, 1::2, 0::2, :]
    x2 = x[:, 0::2, 1::2, :]
    x3 = x[:, 1::2, 1::2, :]
    xm = jnp.concatenate([x0, x1, x2, x3], axis=-1).astype(jnp.float32)
    mean = jnp.mean(xm, axis=-1, keepdims=True)
    var = jnp.mean((xm - mean) ** 2, axis=-1, keepdims=True)
    xn = (xm - mean) / jnp.sqrt(var + LN_EPS)
    y = xn * gamma + beta
    return (y @ weight.T.astype(jnp.float32)).astype(x.dtype)


if __name__ == "__main__":
    key = jax.random.PRNGKey(0)
    B, H, W, C = 2, 16, 16, 4            # dim = C = 4  ->  4*dim = 16, 2*dim = 8
    k_x, k_w, k_g, k_b = jax.random.split(key, 4)

    x = jax.random.normal(k_x, (B, H, W, C), dtype=jnp.float32)
    # nn.Linear(4*dim, 2*dim, bias=False): weight shape (2*dim, 4*dim)
    weight = jax.random.normal(k_w, (2 * C, 4 * C), dtype=jnp.float32) * 0.1
    # nn.LayerNorm(4*dim) params, perturbed deterministically
    gamma = jnp.ones((4 * C,), jnp.float32) + 0.01 * jax.random.normal(k_g, (4 * C,))
    beta = 0.01 * jax.random.normal(k_b, (4 * C,))

    out = patch_merging_2d(x, gamma, beta, weight)
    out = jax.block_until_ready(out)

    ref = _reference(x, gamma, beta, weight)
    assert out.shape == (B, H // 2, W // 2, 2 * C), out.shape
    max_err = float(jnp.max(jnp.abs(out.astype(jnp.float32) - ref.astype(jnp.float32))))
    assert jnp.allclose(out, ref, atol=1e-4, rtol=1e-4), max_err

    print("KERNEL_OK")
</pallas_src>

<mosaic_0001>
module attributes {stable_mosaic.version = 11 : i64} {
  func.func @_patch_merge_kernel(%arg0: i32, %arg1: memref<2x2x8x8xf32, #tpu.memory_space<vmem>>, %arg2: memref<8x8xf32, #tpu.memory_space<vmem>>, %arg3: memref<8x8xf32, #tpu.memory_space<vmem>>, %arg4: memref<1x8xf32, #tpu.memory_space<vmem>>, %arg5: memref<1x8xf32, #tpu.memory_space<vmem>>, %arg6: memref<2x8x8xf32, #tpu.memory_space<vmem>>) attributes {dimension_semantics = [#tpu.dimension_semantics<parallel>], iteration_bounds = array<i64: 8>, scalar_prefetch = 0 : i64, scratch_operands = 0 : i64, tpu.core_type = #tpu.core_type<tc>, window_params = [{transform_indices = @transform_0, window_bounds = array<i64: 2, 2, 8, 8>}, {pipeline_mode = #tpu.pipeline_mode<synchronous>, transform_indices = @transform_1, window_bounds = array<i64: 8, 8>}, {pipeline_mode = #tpu.pipeline_mode<synchronous>, transform_indices = @transform_2, window_bounds = array<i64: 8, 8>}, {pipeline_mode = #tpu.pipeline_mode<synchronous>, transform_indices = @transform_3, window_bounds = array<i64: 1, 8>}, {pipeline_mode = #tpu.pipeline_mode<synchronous>, transform_indices = @transform_4, window_bounds = array<i64: 1, 8>}, {transform_indices = @transform_5, window_bounds = array<i64: 2, 8, 8>}]} {
    %c0 = arith.constant 0 : index
    %c0_0 = arith.constant 0 : index
    %c0_1 = arith.constant 0 : index
    %c0_2 = arith.constant 0 : index
    %0 = vector.load %arg1[%c0, %c0_0, %c0_1, %c0_2] : memref<2x2x8x8xf32, #tpu.memory_space<vmem>>, vector<2x1x8x8xf32>
    %1 = vector.shape_cast %0 : vector<2x1x8x8xf32> to vector<2x8x8xf32>
    %c0_3 = arith.constant 0 : index
    %c1 = arith.constant 1 : index
    %c0_4 = arith.constant 0 : index
    %c0_5 = arith.constant 0 : index
    %2 = vector.load %arg1[%c0_3, %c1, %c0_4, %c0_5] : memref<2x2x8x8xf32, #tpu.memory_space<vmem>>, vector<2x1x8x8xf32>
    %3 = vector.shape_cast %2 : vector<2x1x8x8xf32> to vector<2x8x8xf32>
    %4 = vector.shape_cast %1 : vector<2x8x8xf32> to vector<16x8xf32>
    %5 = vector.shape_cast %3 : vector<2x8x8xf32> to vector<16x8xf32>
    %cst = arith.constant dense<0.000000e+00> : vector<16xf32>
    %6 = vector.multi_reduction <add>, %4, %cst [1] : vector<16x8xf32> to vector<16xf32>
    %7 = vector.shape_cast %6 : vector<16xf32> to vector<16x1xf32>
    %cst_6 = arith.constant dense<0.000000e+00> : vector<16xf32>
    %8 = vector.multi_reduction <add>, %5, %cst_6 [1] : vector<16x8xf32> to vector<16xf32>
    %9 = vector.shape_cast %8 : vector<16xf32> to vector<16x1xf32>
    %10 = arith.addf %7, %9 : vector<16x1xf32>
    %11 = arith.mulf %4, %4 : vector<16x8xf32>
    %cst_7 = arith.constant dense<0.000000e+00> : vector<16xf32>
    %12 = vector.multi_reduction <add>, %11, %cst_7 [1] : vector<16x8xf32> to vector<16xf32>
    %13 = vector.shape_cast %12 : vector<16xf32> to vector<16x1xf32>
    %14 = arith.mulf %5, %5 : vector<16x8xf32>
    %cst_8 = arith.constant dense<0.000000e+00> : vector<16xf32>
    %15 = vector.multi_reduction <add>, %14, %cst_8 [1] : vector<16x8xf32> to vector<16xf32>
    %16 = vector.shape_cast %15 : vector<16xf32> to vector<16x1xf32>
    %17 = arith.addf %13, %16 : vector<16x1xf32>
    %cst_9 = arith.constant 6.250000e-02 : f32
    %18 = vector.broadcast %cst_9 : f32 to vector<16x1xf32>
    %19 = arith.mulf %10, %18 : vector<16x1xf32>
    %cst_10 = arith.constant 6.250000e-02 : f32
    %20 = vector.broadcast %cst_10 : f32 to vector<16x1xf32>
    %21 = arith.mulf %17, %20 : vector<16x1xf32>
    %22 = arith.mulf %19, %19 : vector<16x1xf32>
    %23 = arith.subf %21, %22 : vector<16x1xf32>
    %cst_11 = arith.constant 0.000000e+00 : f32
    %24 = vector.broadcast %cst_11 : f32 to vector<16x1xf32>
    %25 = arith.maximumf %23, %24 : vector<16x1xf32>
    %cst_12 = arith.constant 9.99999974E-6 : f32
    %26 = vector.broadcast %cst_12 : f32 to vector<16x1xf32>
    %27 = arith.addf %25, %26 : vector<16x1xf32>
    %28 = math.rsqrt %27 : vector<16x1xf32>
    %c0_13 = arith.constant 0 : index
    %c0_14 = arith.constant 0 : index
    %29 = vector.load %arg2[%c0_13, %c0_14] : memref<8x8xf32, #tpu.memory_space<vmem>>, vector<8x8xf32>
    %cst_15 = arith.constant dense<0.000000e+00> : vector<16x8xf32>
    %30 = tpu.matmul %4, %29, %cst_15 {dimension_numbers = #tpu.dot_dimension_numbers<[1], [0], [0], [1], [0, 0, 1, 1], [], []>} : vector<16x8xf32>, vector<8x8xf32>, vector<16x8xf32> -> vector<16x8xf32>
    %c0_16 = arith.constant 0 : index
    %c0_17 = arith.constant 0 : index
    %31 = vector.load %arg3[%c0_16, %c0_17] : memref<8x8xf32, #tpu.memory_space<vmem>>, vector<8x8xf32>
    %cst_18 = arith.constant dense<0.000000e+00> : vector<16x8xf32>
    %32 = tpu.matmul %5, %31, %cst_18 {dimension_numbers = #tpu.dot_dimension_numbers<[1], [0], [0], [1], [0, 0, 1, 1], [], []>} : vector<16x8xf32>, vector<8x8xf32>, vector<16x8xf32> -> vector<16x8xf32>
    %33 = arith.addf %30, %32 : vector<16x8xf32>
    %c0_19 = arith.constant 0 : index
    %c0_20 = arith.constant 0 : index
    %34 = vector.load %arg4[%c0_19, %c0_20] : memref<1x8xf32, #tpu.memory_space<vmem>>, vector<1x8xf32>
    %35 = vector.broadcast %19 : vector<16x1xf32> to vector<16x8xf32>
    %36 = vector.broadcast %34 : vector<1x8xf32> to vector<16x8xf32>
    %37 = arith.mulf %35, %36 : vector<16x8xf32>
    %38 = arith.subf %33, %37 : vector<16x8xf32>
    %39 = vector.broadcast %28 : vector<16x1xf32> to vector<16x8xf32>
    %40 = arith.mulf %39, %38 : vector<16x8xf32>
    %c0_21 = arith.constant 0 : index
    %c0_22 = arith.constant 0 : index
    %41 = vector.load %arg5[%c0_21, %c0_22] : memref<1x8xf32, #tpu.memory_space<vmem>>, vector<1x8xf32>
    %42 = vector.broadcast %41 : vector<1x8xf32> to vector<16x8xf32>
    %43 = arith.addf %40, %42 : vector<16x8xf32>
    %44 = vector.shape_cast %43 : vector<16x8xf32> to vector<2x8x8xf32>
    %c0_23 = arith.constant 0 : index
    %c0_24 = arith.constant 0 : index
    %c0_25 = arith.constant 0 : index
    %45 = vector.load %arg6[%c0_23, %c0_24, %c0_25] : memref<2x8x8xf32, #tpu.memory_space<vmem>>, vector<2x8x8xf32>
    tpu.vector_store %arg6[%c0_23, %c0_24, %c0_25], %44 {strides = array<i32>} : memref<2x8x8xf32, #tpu.memory_space<vmem>>, vector<2x8x8xf32>,
    return
  }
  func.func @transform_0(%arg0: i32) -> (i32, i32, i32, i32) {
    %c0_i32 = arith.constant 0 : i32
    %c0_i32_0 = arith.constant 0 : i32
    %c0_i32_1 = arith.constant 0 : i32
    %c0_i32_2 = arith.constant 0 : i32
    return %arg0, %c0_i32, %c0_i32_0, %c0_i32_1 : i32, i32, i32, i32
  }
  func.func @transform_1(%arg0: i32) -> (i32, i32) {
    %c0_i32 = arith.constant 0 : i32
    %c0_i32_0 = arith.constant 0 : i32
    %c0_i32_1 = arith.constant 0 : i32
    return %c0_i32, %c0_i32_0 : i32, i32
  }
  func.func @transform_2(%arg0: i32) -> (i32, i32) {
    %c0_i32 = arith.constant 0 : i32
    %c0_i32_0 = arith.constant 0 : i32
    %c0_i32_1 = arith.constant 0 : i32
    return %c0_i32, %c0_i32_0 : i32, i32
  }
  func.func @transform_3(%arg0: i32) -> (i32, i32) {
    %c0_i32 = arith.constant 0 : i32
    %c0_i32_0 = arith.constant 0 : i32
    %c0_i32_1 = arith.constant 0 : i32
    return %c0_i32, %c0_i32_0 : i32, i32
  }
  func.func @transform_4(%arg0: i32) -> (i32, i32) {
    %c0_i32 = arith.constant 0 : i32
    %c0_i32_0 = arith.constant 0 : i32
    %c0_i32_1 = arith.constant 0 : i32
    return %c0_i32, %c0_i32_0 : i32, i32
  }
  func.func @transform_5(%arg0: i32) -> (i32, i32, i32) {
    %c0_i32 = arith.constant 0 : i32
    %c0_i32_0 = arith.constant 0 : i32
    %c0_i32_1 = arith.constant 0 : i32
    return %arg0, %c0_i32, %c0_i32_0 : i32, i32, i32
  }
}

</mosaic_0001>

<bundles_post_ra>
// kernel: tpu_custom_call.1
= control target key start
LH: loop header
LB: loop body
LE: loop exit
PB: predicated region body
PF: predicated region fallthrough
CT: control target
= control target key end

     0   :  { %s616_s18 = smov 0   ;;  %s663_s0 = inlined_call_operand.vmem [shape: f32[16,2,8,8], index: 0, kind: input, shape index: {}]   ;;  %s664_s1 = inlined_call_operand.vmem [shape: f32[8,8], index: 1, kind: input, shape index: {}]   ;;  %s665_s2 = inlined_call_operand.vmem [shape: f32[8,8], index: 2, kind: input, shape index: {}]   ;;  %s666_s3 = inlined_call_operand.vmem [shape: f32[1,8], index: 3, kind: input, shape index: {}]   ;;  %s667_s4 = inlined_call_operand.vmem [shape: f32[1,8], index: 4, kind: input, shape index: {}]   ;;  %s668_s5 = inlined_call_operand.vmem [shape: f32[16,8,8], index: 5, kind: output, shape index: {}]  }
   0x1 LB: > { %s527_s19 = sadd.s32 4294967295, %s584_s18   ;;  %p531_p0 = scmp.ge.s32.totalorder %s584_s18, 1  ;;  %s584_s18 = sphi %s616_s18, %s15_s18  }
   0x2   : > { %p189_p1 = scmp.lt.s32.totalorder %s584_s18, 9 }
   0x4   : > { %p190_p2 = pnand %p531_p0, %p189_p1 }
   0x5   : > { %v284_v0 = vld [vmem:[%s665_s2] sm:$0xff] (!%p190_p2)  ;;  %s532_s24 = sshll.u32 (!%p190_p2), %s527_s19, 1  ;;  %vm236_vm0 = vcmask (!%p190_p2), 64512  }
   0x6   : > { %193 = sbr.rel (%p190_p2) target bundleno = 240 (0xf0), region = 40  ;;  %v283_v1 = vld [vmem:[%s664_s1] sm:$0xff] (!%p190_p2)  ;;  %554 = vmatprep.subr.mxu1 (!%p190_p2), %v284_v0  ;;  %p219_p3 = scmp.lt.s32.totalorder (!%p190_p2), %s532_s24, 15 }
   0x7   : > { %559 = vmatprep.subr.mxu0 (!%p190_p2), %v283_v1  ;;  %555 = vmatpush3.msra.mxu1 (!%p190_p2), %v284_v0  ;;  %v543_v42 = vld [vmem:[%s666_s3] ss:$0 sm:$0xff] (!%p190_p2) }
   0x8   : > { %560 = vmatpush3.msra.mxu0 (!%p190_p2), %v283_v1  ;;  %v544_v53 = vld [vmem:[%s667_s4] ss:$0 sm:$0xff] (!%p190_p2) }
   0xd   : > { %s670_s24 = smov (!%p219_p3, %s532_s24), 15 }
   0xe   : > { %s547_s25 = sshll.u32 %s670_s24, 4  ;;  %s536_s6 = sshll.u32 %s670_s24, 3 }
   0xf   : > { %s223_s28 = scalar_lea.vmem %s663_s0, %s547_s25  ;;  %s229_s11 = scalar_lea.vmem %s668_s5, %s536_s6 }
  0x10   : > { %v537_v2 = vld [vmem:[%s223_s28 + $0x8] sm:$0xff]  ;;  %v231_v3 = vld [vmem:[%s223_s28] sm:$0xff]  ;;  %v538_v4 = vld [vmem:[%s223_s28 + $0x18] sm:$0xff] }
  0x11   : > { %556 = vmatprep.mubr.msk.f32.mxu1 %vm236_vm0, %v537_v2  ;;  %561 = vmatprep.mubr.msk.f32.mxu0 %vm236_vm0, %v231_v3  ;;  %v232_v5 = vld [vmem:[%s223_s28 + $0x10] sm:$0xff]  ;;  %v237_v6 = vsel %vm236_vm0, %v231_v3, 0.0  ;;  %v243_v7 = vsel %vm236_vm0, %v537_v2, 0.0  ;;  %v246_v9 = vsel %vm236_vm0, %v538_v4, 0.0  ;;  %v251_v10 = vmul.f32 %v231_v3, %v231_v3 }
  0x12   : > { %557 = vmatmul.mubr.msk.f32.vlgmr.msra.gmra.mrb[0].mxu1 %vm236_vm0, %v538_v4  ;;  %562 = vmatmul.mubr.msk.f32.vlgmr.msra.gmra.mrb[0].mxu0 %vm236_vm0, %v232_v5  ;;  %v240_v8 = vsel %vm236_vm0, %v232_v5, 0.0  ;;  %v252_v11 = vmul.f32 %v232_v5, %v232_v5  ;;  %v259_v14 = vmul.f32 %v537_v2, %v537_v2  ;;  %v260_v15 = vmul.f32 %v538_v4, %v538_v4 }
  0x13   : > { %238 = vadd.xlane.f32.xlu0 %v237_v6  ;;  %244 = vadd.xlane.f32.xlu1 %v243_v7  ;;  %v253_v12 = vsel %vm236_vm0, %v251_v10, 0.0 }
  0x14   : > { %v256_v13 = vsel %vm236_vm0, %v252_v11, 0.0  ;;  %v261_v16 = vsel %vm236_vm0, %v259_v14, 0.0  ;;  %v264_v17 = vsel %vm236_vm0, %v260_v15, 0.0 }
  0x17   : > { %241 = vadd.xlane.f32.xlu0 %v240_v8  ;;  %247 = vadd.xlane.f32.xlu1 %v246_v9 }
  0x1b   : > { %254 = vadd.xlane.f32.xlu0 %v253_v12  ;;  %257 = vadd.xlane.f32.xlu1 %v256_v13 }
  0x1f   : > { %262 = vadd.xlane.f32.xlu0 %v261_v16  ;;  %265 = vadd.xlane.f32.xlu1 %v264_v17 }
  0xa0   : > { %v245_v18 = vpop.xlane.xlu1 %244  ;;  %v239_v19 = vpop.xlane.xlu0 %238 }
  0xa1   : > { %v249_v25 = vadd.f32 %v245_v18, %v239_v19 }
  0xa3   : > { %v269_v30 = vmul.f32 0.0625, %v249_v25 }
  0xa4   : > { %v248_v20 = vpop.xlane.xlu1 %247  ;;  %v242_v21 = vpop.xlane.xlu0 %241 }
  0xa5   : > { %v250_v24 = vadd.f32 %v248_v20, %v242_v21  ;;  %v273_v34 = vmul.f32 %v269_v30, %v269_v30  ;;  %v454_v49 = vmul.f32 %v543_v42, %v269_v30 }
  0xa7   : > { %v270_v28 = vmul.f32 0.0625, %v250_v24 }
  0xa8   : > { %v258_v22 = vpop.xlane.xlu1 %257  ;;  %v255_v23 = vpop.xlane.xlu0 %254 }
  0xa9   : > { %v274_v32 = vmul.f32 %v270_v28, %v270_v28  ;;  %v455_v45 = vmul.f32 %v543_v42, %v270_v28 }
  0xac   : > { %v266_v26 = vpop.xlane.xlu1 %265  ;;  %v263_v27 = vpop.xlane.xlu0 %262 }
  0xad   : > { %v268_v29 = vadd.f32 %v266_v26, %v258_v22  ;;  %v267_v31 = vadd.f32 %v263_v27, %v255_v23 }
  0xaf   : > { %v272_v33 = vmul.f32 0.0625, %v268_v29  ;;  %v271_v35 = vmul.f32 0.0625, %v267_v31 }
  0xb1   : > { %v276_v36 = vsub.f32 %v272_v33, %v274_v32  ;;  %v275_v37 = vsub.f32 %v271_v35, %v273_v34 }
  0xb3   : > { %v278_v38 = vmax.f32 %v276_v36, 0.0  ;;  %v277_v39 = vmax.f32 %v275_v37, 0.0 }
  0xb5   : > { %v280_v40 = vadd.f32 1e-05, %v278_v38  ;;  %v279_v41 = vadd.f32 1e-05, %v277_v39 }
  0xb7   : > { %574 = vrsqrt.f32 %v280_v40 }
  0xb8   : > { %576 = vrsqrt.f32 %v279_v41 }
  0xc1   : > { %v575_v52 = vpop.eup %574 }
  0xc2   : > { %v577_v55 = vpop.eup %576 }
  0xe5   : > { %v558_v43 = vpop.f32.mrb[0].mxu1  ;;  %v563_v44 = vpop.f32.mrb[0].mxu0 }
  0xe6   : > { %v444_v46 = vadd.f32 %v563_v44, %v558_v43  ;;  %v357_v47 = vpop.f32.mrb[1].mxu1  ;;  %v438_v48 = vpop.f32.mrb[1].mxu0 }
  0xe7   : > { %v439_v50 = vadd.f32 %v438_v48, %v357_v47 }
  0xe8   : > { %v457_v51 = vsub.f32 %v444_v46, %v455_v45 }
  0xe9   : > { %v456_v54 = vsub.f32 %v439_v50, %v454_v49 }
  0xea   : > { %v459_v56 = vmul.f32 %v575_v52, %v457_v51 }
  0xeb   : > { %v458_v57 = vmul.f32 %v577_v55, %v456_v54 }
  0xec   : > { %v468_v58 = vadd.f32 %v544_v53, %v459_v56 }
  0xed   : > { %v467_v59 = vadd.f32 %v544_v53, %v458_v57 }
  0xee   : > { %470 = vst.msk [vmem:[%s229_s11 + $0x8] sm:$0xff] %vm236_vm0, %v468_v58 }
  0xef   : > { %469 = vst.msk [vmem:[%s229_s11] sm:$0xff] %vm236_vm0, %v467_v59 }
  0xf0 PF: > { %s15_s18 = sadd.s32 1, %s584_s18  }
  0xf1   : > { %p12_p4 = scmp.ge.s32.totalorder %s15_s18, 10  }
  0xf3   :  { %14 = sbr.rel (!%p12_p4) target bundleno = 1 (0x1), region = 71 }

</bundles_post_ra>
